<compile_context>
chip_gen: v7x
topology: tpu7x:2x2x1
jax: 0.10.0
libtpu: 0.0.40
codegen_flags: <defaults>
</compile_context>

<pallas_src>
import functools

import jax
import jax.numpy as jnp
from jax.experimental import pallas as pl
from jax.experimental.pallas import tpu as pltpu


LANE = 128      # TPU lane width; feature dims padded to a multiple of this.
SUBLANE = 8     # sublane granularity; batch tiles are multiples of this.
MAX_TILE = 1024  # rows per batch tile (keeps double-buffered tiles ~1-2 MiB).


def _round_up(n, m):
    return ((n + m - 1) // m) * m


# ---------------------------------------------------------------------------
# Kernel
# ---------------------------------------------------------------------------
def _mlp_kernel(dropout_p, *refs):
    """One batch tile of: x -> L1 -> ReLU -> Drop -> L2 -> ReLU -> Drop -> L3."""
    if dropout_p:
        (seed_ref,                                           # SMEM (1,) int32
         x_ref, w1_ref, b1_ref, w2_ref, b2_ref, w3_ref, b3_ref,
         o_ref) = refs
        # Decorrelate per-tile streams by folding (seed, tile_id) into the
        # hardware PRNG seed (instead of adjacent integer seeds).
        pltpu.prng_seed(seed_ref[0], pl.program_id(0))
        inv_keep = jnp.float32(1.0 / (1.0 - dropout_p))
        thresh = jnp.uint32(min(int(dropout_p * 2.0 ** 32), 2 ** 32 - 1))
    else:
        (x_ref, w1_ref, b1_ref, w2_ref, b2_ref, w3_ref, b3_ref, o_ref) = refs

    def hidden_layer(h_bf16, w_ref, b_ref):
        pre = jnp.dot(h_bf16, w_ref[...],
                      preferred_element_type=jnp.float32) + b_ref[...]
        act = jnp.maximum(pre, 0.0)                          # ReLU
        if dropout_p:                                        # inverted dropout
            bits = pltpu.bitcast(pltpu.prng_random_bits(act.shape), jnp.uint32)
            act = jnp.where(bits >= thresh, act * inv_keep, 0.0)
        return act.astype(jnp.bfloat16)                      # bf16 into next MXU

    # x may arrive as f32 (direct feed, no wrapper pad pass) or bf16 (padded
    # slab); the cast is a VPU op hidden under the tile DMA.
    h = hidden_layer(x_ref[...].astype(jnp.bfloat16), w1_ref, b1_ref)
    h = hidden_layer(h, w2_ref, b2_ref)
    # Last layer: no activation, no dropout.
    out = jnp.dot(h, w3_ref[...], preferred_element_type=jnp.float32) + b3_ref[...]
    o_ref[...] = out.astype(o_ref.dtype)


# ---------------------------------------------------------------------------
# Parameter prep + wrapper
# ---------------------------------------------------------------------------
def prepare_params(params):
    """Pad Linear params to lane multiples; weights -> bf16, biases -> f32.

    params: ((w, b), ...) with w [in, out] (transpose of torch Linear.weight)
            and b [1, out]. Zero padding keeps the math exactly equivalent.
    """
    padded = []
    for w, b in params:
        fi, fo = w.shape
        fi_p, fo_p = _round_up(fi, LANE), _round_up(fo, LANE)
        wp = jnp.zeros((fi_p, fo_p), jnp.bfloat16).at[:fi, :fo].set(
            w.astype(jnp.bfloat16))
        bp = jnp.zeros((1, fo_p), jnp.float32).at[:, :fo].set(
            b.astype(jnp.float32))
        padded.append((wp, bp))
    return tuple(padded)


def base_tracking_output_forward(x, params, dropout_p=None, seed=0,
                                 batch_tile=None, out_dtype=jnp.bfloat16,
                                 unpad=True):
    """Pallas implementation of BaseTrackingOutputModel.loop_on_layers.

    x      : [B, D_in] float32
    params : ((w1, b1), (w2, b2), (w3, b3)) unpadded, w_i [in, out], b_i [1, out]
    out_dtype : bf16 by default (halves the HBM writeback); pass jnp.float32
                if the consumer strictly needs f32.
    unpad  : if False, return the padded lane-dense (B_p, d_out_p) slab so the
             caller can fold the un-pad slice into a downstream op.
    """
    if dropout_p:
        assert 0.0 < dropout_p < 1.0, "dropout probability must be in (0, 1)"

    (w1, b1), (w2, b2), (w3, b3) = prepare_params(params)
    B, d_in = x.shape
    d_out = params[-1][0].shape[1]
    d_in_p, d_out_p = w1.shape[0], w3.shape[1]

    # Adaptive batch tile: multiple of 8 sublanes, 512-1024 rows for large
    # batches (per-step ~0.35us overhead amortized, near HBM roofline), capped
    # at ~half the batch so the grid keeps >=2 steps and the "parallel" batch
    # axis can shard across v7x's two TensorCores.  Double-buffered x/out
    # tiles stay ~1-2 MiB, far under every generation's VMEM.
    if batch_tile is None:
        B8 = _round_up(B, SUBLANE)
        tb = max(SUBLANE, min(MAX_TILE, _round_up(pl.cdiv(B8, 2), SUBLANE)))
    else:
        tb = _round_up(batch_tile, SUBLANE)
    B_p = _round_up(B, tb)

    # Feed x directly (no extra HBM pad/cast pass) when its shape already
    # matches the padded grid; otherwise build a bf16 zero-padded slab.
    if B_p == B and d_in_p == d_in:
        x_in = x
    else:
        # TODO(synk): could instead fuse this pad/cast into the pallas_call
        # via compiler_params allow_input_fusion.
        x_in = jnp.zeros((B_p, d_in_p), jnp.bfloat16).at[:B, :d_in].set(
            x.astype(jnp.bfloat16))

    # Weights/biases: full blocks, constant index map -> resident in VMEM
    # across grid steps (DMA'd once).
    full = lambda a: pl.BlockSpec(a.shape, lambda i, *_: (0,) * a.ndim)
    in_specs = [
        pl.BlockSpec((tb, d_in_p), lambda i, *_: (i, 0)),    # x tile
        full(w1), full(b1), full(w2), full(b2), full(w3), full(b3),
    ]
    args = [x_in, w1, b1, w2, b2, w3, b3]

    # Only pay for the scalar-prefetch seed when dropout is actually enabled.
    num_prefetch = 0
    if dropout_p:
        num_prefetch = 1
        args = [jnp.asarray([seed], dtype=jnp.int32)] + args

    out_p = pl.pallas_call(
        functools.partial(_mlp_kernel, dropout_p),
        out_shape=jax.ShapeDtypeStruct((B_p, d_out_p), out_dtype),
        grid_spec=pltpu.PrefetchScalarGridSpec(
            num_scalar_prefetch=num_prefetch,
            grid=(B_p // tb,),
            in_specs=in_specs,
            out_specs=pl.BlockSpec((tb, d_out_p), lambda i, *_: (i, 0)),
        ),
        compiler_params=pltpu.CompilerParams(
            dimension_semantics=("parallel",),
        ),
    )(*args)

    if not unpad:
        return out_p
    # Strip batch / lane padding back to the logical output shape.
    return out_p[:B, :d_out]


# ---------------------------------------------------------------------------
# Synthetic params + references
# ---------------------------------------------------------------------------
def init_params(key, d_in, d_hidden, d_out):
    """Deterministic synthetic Linear parameters (kaiming-uniform-ish)."""
    ks = jax.random.split(key, 6)

    def lin(kw, kb, fan_in, fan_out):
        bound = 1.0 / jnp.sqrt(fan_in)
        w = jax.random.uniform(kw, (fan_in, fan_out), jnp.float32, -bound, bound)
        b = jax.random.uniform(kb, (1, fan_out), jnp.float32, -bound, bound)
        return w, b

    return (lin(ks[0], ks[1], d_in, d_hidden),
            lin(ks[2], ks[3], d_hidden, d_hidden),
            lin(ks[4], ks[5], d_hidden, d_out))


def reference_forward(x, params):
    """Pure-f32 JAX reference of loop_on_layers (dropout identity when None)."""
    (w1, b1), (w2, b2), (w3, b3) = params
    h = jnp.maximum(x @ w1 + b1, 0.0)
    h = jnp.maximum(h @ w2 + b2, 0.0)
    return h @ w3 + b3


def reference_forward_bf16(x, params):
    """Reference using the same bf16-input / f32-accumulate dots as the kernel."""
    (w1, b1), (w2, b2), (w3, b3) = params
    bf = lambda a: a.astype(jnp.bfloat16)
    h = jnp.maximum(
        jnp.dot(bf(x), bf(w1), preferred_element_type=jnp.float32) + b1, 0.0)
    h = jnp.maximum(
        jnp.dot(bf(h), bf(w2), preferred_element_type=jnp.float32) + b2, 0.0)
    return jnp.dot(bf(h), bf(w3), preferred_element_type=jnp.float32) + b3


if __name__ == "__main__":
    key = jax.random.PRNGKey(0)
    k_x, k_p, k_x2, k_p2 = jax.random.split(key, 4)

    # --- Small case (typical tracking head: 3 output dirs) -----------------
    B, D_IN, D_HID, D_OUT = 8, 32, 64, 3
    x = jax.random.normal(k_x, (B, D_IN), dtype=jnp.float32)
    params = init_params(k_p, D_IN, D_HID, D_OUT)

    # Default module config: dropout=None -> dropout sub-layer is identity.
    out = base_tracking_output_forward(x, params, dropout_p=None)
    out = jax.block_until_ready(out)
    assert out.shape == (B, D_OUT)
    out_f32 = out.astype(jnp.float32)

    # Tight check against the kernel's exact numerics (bf16 in, f32 acc)...
    ref_bf16 = reference_forward_bf16(x, params)
    assert jnp.allclose(out_f32, ref_bf16, atol=2e-2, rtol=2e-2), \
        "mismatch vs bf16 reference"
    # ...and a loose check against the pure-f32 module semantics (bf16
    # weights/output deviate from torch f32 Linear by ~1e-2 relative).
    ref_f32 = reference_forward(x, params)
    assert jnp.allclose(out_f32, ref_f32, atol=6e-2, rtol=6e-2), \
        "mismatch vs f32 reference"

    # --- Larger lane-aligned case: exercises the direct-f32-feed path (no
    # wrapper pad pass) and the multi-step megacore-splittable grid. ---------
    B2, D2 = 2048, 128
    x2 = jax.random.normal(k_x2, (B2, D2), dtype=jnp.float32)
    params2 = init_params(k_p2, D2, D2, 3)
    out2 = jax.block_until_ready(base_tracking_output_forward(x2, params2))
    assert out2.shape == (B2, 3)
    ref2 = reference_forward_bf16(x2, params2)
    assert jnp.allclose(out2.astype(jnp.float32), ref2, atol=3e-2, rtol=3e-2), \
        "mismatch vs bf16 reference (large batch)"

    # TODO(synk): forward / compute_loss / sample_tracking_directions are
    # abstract (NotImplementedError) in the base class; not implemented here.
    print("KERNEL_OK")
</pallas_src>

<mosaic_0001>
module attributes {stable_mosaic.version = 11 : i64} {
  func.func @_mlp_kernel(%arg0: i32, %arg1: memref<8x128xbf16, #tpu.memory_space<vmem>>, %arg2: memref<128x128xbf16, #tpu.memory_space<vmem>>, %arg3: memref<1x128xf32, #tpu.memory_space<vmem>>, %arg4: memref<128x128xbf16, #tpu.memory_space<vmem>>, %arg5: memref<1x128xf32, #tpu.memory_space<vmem>>, %arg6: memref<128x128xbf16, #tpu.memory_space<vmem>>, %arg7: memref<1x128xf32, #tpu.memory_space<vmem>>, %arg8: memref<8x128xbf16, #tpu.memory_space<vmem>>) attributes {dimension_semantics = [#tpu.dimension_semantics<parallel>], iteration_bounds = array<i64: 1>, scalar_prefetch = 0 : i64, scratch_operands = 0 : i64, tpu.core_type = #tpu.core_type<tc>, window_params = [{transform_indices = @transform_0, window_bounds = array<i64: 8, 128>}, {pipeline_mode = #tpu.pipeline_mode<synchronous>, transform_indices = @transform_1, window_bounds = array<i64: 128, 128>}, {pipeline_mode = #tpu.pipeline_mode<synchronous>, transform_indices = @transform_2, window_bounds = array<i64: 1, 128>}, {pipeline_mode = #tpu.pipeline_mode<synchronous>, transform_indices = @transform_3, window_bounds = array<i64: 128, 128>}, {pipeline_mode = #tpu.pipeline_mode<synchronous>, transform_indices = @transform_4, window_bounds = array<i64: 1, 128>}, {pipeline_mode = #tpu.pipeline_mode<synchronous>, transform_indices = @transform_5, window_bounds = array<i64: 128, 128>}, {pipeline_mode = #tpu.pipeline_mode<synchronous>, transform_indices = @transform_6, window_bounds = array<i64: 1, 128>}, {transform_indices = @transform_7, window_bounds = array<i64: 8, 128>}]} {
    %c0 = arith.constant 0 : index
    %c0_0 = arith.constant 0 : index
    %0 = vector.load %arg1[%c0, %c0_0] : memref<8x128xbf16, #tpu.memory_space<vmem>>, vector<8x128xbf16>
    %c0_1 = arith.constant 0 : index
    %c0_2 = arith.constant 0 : index
    %1 = vector.load %arg2[%c0_1, %c0_2] : memref<128x128xbf16, #tpu.memory_space<vmem>>, vector<128x128xbf16>
    %cst = arith.constant dense<0.000000e+00> : vector<8x128xf32>
    %2 = tpu.matmul %0, %1, %cst {dimension_numbers = #tpu.dot_dimension_numbers<[1], [0], [0], [1], [0, 0, 1, 1], [], []>} : vector<8x128xbf16>, vector<128x128xbf16>, vector<8x128xf32> -> vector<8x128xf32>
    %c0_3 = arith.constant 0 : index
    %c0_4 = arith.constant 0 : index
    %3 = vector.load %arg3[%c0_3, %c0_4] : memref<1x128xf32, #tpu.memory_space<vmem>>, vector<1x128xf32>
    %4 = vector.broadcast %3 : vector<1x128xf32> to vector<8x128xf32>
    %5 = arith.addf %2, %4 : vector<8x128xf32>
    %cst_5 = arith.constant 0.000000e+00 : f32
    %6 = vector.broadcast %cst_5 : f32 to vector<8x128xf32>
    %7 = arith.maximumf %5, %6 : vector<8x128xf32>
    %8 = arith.truncf %7 : vector<8x128xf32> to vector<8x128xbf16>
    %c0_6 = arith.constant 0 : index
    %c0_7 = arith.constant 0 : index
    %9 = vector.load %arg4[%c0_6, %c0_7] : memref<128x128xbf16, #tpu.memory_space<vmem>>, vector<128x128xbf16>
    %cst_8 = arith.constant dense<0.000000e+00> : vector<8x128xf32>
    %10 = tpu.matmul %8, %9, %cst_8 {dimension_numbers = #tpu.dot_dimension_numbers<[1], [0], [0], [1], [0, 0, 1, 1], [], []>} : vector<8x128xbf16>, vector<128x128xbf16>, vector<8x128xf32> -> vector<8x128xf32>
    %c0_9 = arith.constant 0 : index
    %c0_10 = arith.constant 0 : index
    %11 = vector.load %arg5[%c0_9, %c0_10] : memref<1x128xf32, #tpu.memory_space<vmem>>, vector<1x128xf32>
    %12 = vector.broadcast %11 : vector<1x128xf32> to vector<8x128xf32>
    %13 = arith.addf %10, %12 : vector<8x128xf32>
    %cst_11 = arith.constant 0.000000e+00 : f32
    %14 = vector.broadcast %cst_11 : f32 to vector<8x128xf32>
    %15 = arith.maximumf %13, %14 : vector<8x128xf32>
    %16 = arith.truncf %15 : vector<8x128xf32> to vector<8x128xbf16>
    %c0_12 = arith.constant 0 : index
    %c0_13 = arith.constant 0 : index
    %17 = vector.load %arg6[%c0_12, %c0_13] : memref<128x128xbf16, #tpu.memory_space<vmem>>, vector<128x128xbf16>
    %cst_14 = arith.constant dense<0.000000e+00> : vector<8x128xf32>
    %18 = tpu.matmul %16, %17, %cst_14 {dimension_numbers = #tpu.dot_dimension_numbers<[1], [0], [0], [1], [0, 0, 1, 1], [], []>} : vector<8x128xbf16>, vector<128x128xbf16>, vector<8x128xf32> -> vector<8x128xf32>
    %c0_15 = arith.constant 0 : index
    %c0_16 = arith.constant 0 : index
    %19 = vector.load %arg7[%c0_15, %c0_16] : memref<1x128xf32, #tpu.memory_space<vmem>>, vector<1x128xf32>
    %20 = vector.broadcast %19 : vector<1x128xf32> to vector<8x128xf32>
    %21 = arith.addf %18, %20 : vector<8x128xf32>
    %22 = arith.truncf %21 : vector<8x128xf32> to vector<8x128xbf16>
    %c0_17 = arith.constant 0 : index
    %c0_18 = arith.constant 0 : index
    %23 = vector.load %arg8[%c0_17, %c0_18] : memref<8x128xbf16, #tpu.memory_space<vmem>>, vector<8x128xbf16>
    tpu.vector_store %arg8[%c0_17, %c0_18], %22 {strides = array<i32>} : memref<8x128xbf16, #tpu.memory_space<vmem>>, vector<8x128xbf16>,
    return
  }
  func.func @transform_0(%arg0: i32) -> (i32, i32) {
    %c0_i32 = arith.constant 0 : i32
    %c0_i32_0 = arith.constant 0 : i32
    return %arg0, %c0_i32 : i32, i32
  }
  func.func @transform_1(%arg0: i32) -> (i32, i32) {
    %c0_i32 = arith.constant 0 : i32
    %c0_i32_0 = arith.constant 0 : i32
    %c0_i32_1 = arith.constant 0 : i32
    return %c0_i32, %c0_i32_0 : i32, i32
  }
  func.func @transform_2(%arg0: i32) -> (i32, i32) {
    %c0_i32 = arith.constant 0 : i32
    %c0_i32_0 = arith.constant 0 : i32
    %c0_i32_1 = arith.constant 0 : i32
    return %c0_i32, %c0_i32_0 : i32, i32
  }
  func.func @transform_3(%arg0: i32) -> (i32, i32) {
    %c0_i32 = arith.constant 0 : i32
    %c0_i32_0 = arith.constant 0 : i32
    %c0_i32_1 = arith.constant 0 : i32
    return %c0_i32, %c0_i32_0 : i32, i32
  }
  func.func @transform_4(%arg0: i32) -> (i32, i32) {
    %c0_i32 = arith.constant 0 : i32
    %c0_i32_0 = arith.constant 0 : i32
    %c0_i32_1 = arith.constant 0 : i32
    return %c0_i32, %c0_i32_0 : i32, i32
  }
  func.func @transform_5(%arg0: i32) -> (i32, i32) {
    %c0_i32 = arith.constant 0 : i32
    %c0_i32_0 = arith.constant 0 : i32
    %c0_i32_1 = arith.constant 0 : i32
    return %c0_i32, %c0_i32_0 : i32, i32
  }
  func.func @transform_6(%arg0: i32) -> (i32, i32) {
    %c0_i32 = arith.constant 0 : i32
    %c0_i32_0 = arith.constant 0 : i32
    %c0_i32_1 = arith.constant 0 : i32
    return %c0_i32, %c0_i32_0 : i32, i32
  }
  func.func @transform_7(%arg0: i32) -> (i32, i32) {
    %c0_i32 = arith.constant 0 : i32
    %c0_i32_0 = arith.constant 0 : i32
    return %arg0, %c0_i32 : i32, i32
  }
}

</mosaic_0001>

<bundles_post_ra>
// kernel: tpu_custom_call.1
= control target key start
LH: loop header
LB: loop body
LE: loop exit
PB: predicated region body
PF: predicated region fallthrough
CT: control target
= control target key end

     0   :  { %12 = vsyncpa [#allocation3], 0  ;;  %s860_s0 = inlined_call_operand.hbm [shape: bf16[8,128], index: 0, kind: input, shape index: {}]   ;;  %s861_s1 = inlined_call_operand.hbm [shape: bf16[128,128], index: 1, kind: input, shape index: {}]   ;;  %s862_s2 = inlined_call_operand.vmem [shape: f32[1,128], index: 2, kind: input, shape index: {}]   ;;  %s863_s3 = inlined_call_operand.hbm [shape: bf16[128,128], index: 3, kind: input, shape index: {}]   ;;  %s864_s4 = inlined_call_operand.vmem [shape: f32[1,128], index: 4, kind: input, shape index: {}]   ;;  %s865_s5 = inlined_call_operand.hbm [shape: bf16[128,128], index: 5, kind: input, shape index: {}]   ;;  %s866_s6 = inlined_call_operand.vmem [shape: f32[1,128], index: 6, kind: input, shape index: {}]   ;;  %s867_s7 = inlined_call_operand.hbm [shape: bf16[8,128], index: 7, kind: output, shape index: {}]  }
   0x1   :  { %13 = vsyncpa [#allocation6], 0 }
   0x2   :  { %14 = vsyncpa [#allocation9], 0 }
   0x3   :  { %15 = vsyncpa [#allocation4], 0  ;;  %s703_s24 = smov [#allocation5]   ;;  %s585_s28 = scalar_lea.hbm %s861_s1, 1024 }
   0x4   :  { %s31_s25 = sshll.u32 %s703_s24, 4  ;;  %p586_p0 = scmp.ne.s32.totalorder %s861_s1, %s585_s28  ;;  %s32_s25 = int_to_ptr.vmem [resolvable:$true] %s31_s25 }
   0x5   :  { %p589_p1 = scmp.lt.u32.totalorder %s585_s28, %s861_s1 }
   0x7   :  { %p591_p2 = pnand %p589_p1, %p586_p0 }
   0x9   :  { %594 = shalt.err (!%p591_p2)
}
   0xa   :  { %s595_s10 = scalar_lea.vmem %s32_s25, 1024  ;;  %p600_p4 = scmp.lt.s32.totalorder %s32_s25, %s32_s25 }
   0xb   :  { %p596_p3 = scmp.ne.s32.totalorder %s32_s25, %s595_s10  ;;  %p601_p5 = scmp.lt.s32.totalorder %s595_s10, %s595_s10 }
   0xd   :  { %p602_p6 = por %p601_p5, %p600_p4 }
   0xf   :  { %p603_p7 = pnand %p602_p6, %p596_p3 }
  0x11   :  { %606 = shalt.err (!%p603_p7)
}
  0x12   :  { %s704_s11 = smov 64   ;;  %s705_s12 = smov 4  }
  0x13   :  { %37 = dma.hbm_to_vmem [thread:$0]  %s861_s1, 1024, %s32_s25, [#allocation6], %s704_s11, %s704_s11, %s705_s12  }
  0x14   :  { %s706_s15 = smov [#allocation2]   ;;  %s707_s17 = smov [#allocation7]  }
  0x15   :  { %s22_s16 = sshll.u32 %s706_s15, 4  ;;  %s45_s18 = sshll.u32 %s707_s17, 4  ;;  %s23_s16 = int_to_ptr.vmem [resolvable:$true] %s22_s16  ;;  %s46_s18 = int_to_ptr.vmem [resolvable:$true] %s45_s18 }
  0x16   :  { %s607_s21 = scalar_lea.hbm %s860_s0, 64 }
  0x17   :  { %p608_p8 = scmp.ne.s32.totalorder %s860_s0, %s607_s21  ;;  %p611_p9 = scmp.lt.u32.totalorder %s607_s21, %s860_s0 }
  0x19   :  { %p613_p10 = pnand %p611_p9, %p608_p8 }
  0x1b   :  { %616 = shalt.err (!%p613_p10)
}
  0x1c   :  { %s617_s1 = scalar_lea.vmem %s23_s16, 64  ;;  %p622_p12 = scmp.lt.s32.totalorder %s23_s16, %s23_s16 }
  0x1d   :  { %p618_p11 = scmp.ne.s32.totalorder %s23_s16, %s617_s1  ;;  %p623_p13 = scmp.lt.s32.totalorder %s617_s1, %s617_s1 }
  0x1f   :  { %p624_p0 = por %p623_p13, %p622_p12 }
  0x21   :  { %p625_p1 = pnand %p624_p0, %p618_p11 }
  0x23   :  { %628 = shalt.err (!%p625_p1)
}
  0x24   :  { %25 = dma.hbm_to_vmem [thread:$0]  %s860_s0, 64, %s23_s16, [#allocation3]  }
  0x25   :  { %s629_s30 = scalar_lea.hbm %s863_s3, 1024 }
  0x26   :  { %p630_p2 = scmp.ne.s32.totalorder %s863_s3, %s629_s30  ;;  %p633_p3 = scmp.lt.u32.totalorder %s629_s30, %s863_s3 }
  0x28   :  { %p635_p4 = pnand %p633_p3, %p630_p2 }
  0x2a   :  { %638 = shalt.err (!%p635_p4)
}
  0x2b   :  { %s639_s14 = scalar_lea.vmem %s46_s18, 1024  ;;  %p644_p6 = scmp.lt.s32.totalorder %s46_s18, %s46_s18 }
  0x2c   :  { %p640_p5 = scmp.ne.s32.totalorder %s46_s18, %s639_s14  ;;  %p645_p7 = scmp.lt.s32.totalorder %s639_s14, %s639_s14 }
  0x2e   :  { %p646_p8 = por %p645_p7, %p644_p6 }
  0x30   :  { %p647_p9 = pnand %p646_p8, %p640_p5 }
  0x32   :  { %650 = shalt.err (!%p647_p9)
}
  0x33   :  { %51 = dma.hbm_to_vmem [thread:$0]  %s863_s3, 1024, %s46_s18, [#allocation6], %s704_s11, %s704_s11, %s705_s12  }
  0x34   :  { %s708_s16 = smov [#allocation8]   ;;  %s651_s21 = scalar_lea.hbm %s865_s5, 1024 }
  0x35   :  { %s59_s17 = sshll.u32 %s708_s16, 4  ;;  %p652_p10 = scmp.ne.s32.totalorder %s865_s5, %s651_s21  ;;  %s60_s17 = int_to_ptr.vmem [resolvable:$true] %s59_s17 }
  0x36   :  { %p655_p11 = scmp.lt.u32.totalorder %s651_s21, %s865_s5 }
  0x38   :  { %p657_p12 = pnand %p655_p11, %p652_p10 }
  0x3a   :  { %660 = shalt.err (!%p657_p12)
}
  0x3b   :  { %s661_s1 = scalar_lea.vmem %s60_s17, 1024  ;;  %p666_p0 = scmp.lt.s32.totalorder %s60_s17, %s60_s17 }
  0x3c   :  { %p662_p13 = scmp.ne.s32.totalorder %s60_s17, %s661_s1  ;;  %p667_p1 = scmp.lt.s32.totalorder %s661_s1, %s661_s1 }
  0x3e   :  { %p668_p2 = por %p667_p1, %p666_p0 }
  0x40   :  { %p669_p3 = pnand %p668_p2, %p662_p13 }
  0x42   :  { %672 = shalt.err (!%p669_p3)
}
  0x43   :  { %65 = dma.hbm_to_vmem [thread:$0]  %s865_s5, 1024, %s60_s17, [#allocation9], %s704_s11, %s704_s11, %s705_s12  }
  0x44   :  { %695 = dma.done.wait [#allocation3], 64  }
  0x45   :  { %696 = vsyncadd [#allocation3], 4294967232 }
  0x46   :  { %697 = dma.done.wait [#allocation6], 2048  }
  0x47   :  { %698 = vsyncadd [#allocation6], 4294965248 }
  0x48   :  { %699 = dma.done.wait [#allocation9], 1024  }
  0x49   :  { %700 = vsyncadd [#allocation9], 4294966272  ;;  %v709_v0 = vmov 0.0   ;;  %vm710_vm0 = vmmov 0   ;;  %v561_v1 = vld [vmem:[#allocation5] sm:$0xff]   ;;  %v562_v2 = vld [vmem:[#allocation5 + $0x8] sm:$0xff]  }
  0x4a   :  { %492 = vmatprep.subr.bf16.mxu0 %v709_v0  ;;  %508 = vmatprep.mubr.msk.bf16.mxu0 %vm710_vm0, %v709_v0  ;;  %v563_v3 = vld [vmem:[#allocation5 + $0x10] sm:$0xff]   ;;  %v569_v4 = vld [vmem:[#allocation7] sm:$0xff]   ;;  %v564_v5 = vld [vmem:[#allocation5 + $0x18] sm:$0xff]   ;;  %s711_s28 = smov [#allocation10]  }
  0x4b   :  { %512 = vmatprep.subr.bf16.mxu1 %v709_v0  ;;  %528 = vmatprep.mubr.msk.bf16.mxu1 %vm710_vm0, %v709_v0  ;;  %v570_v6 = vld [vmem:[#allocation7 + $0x8] sm:$0xff]   ;;  %v565_v7 = vld [vmem:[#allocation5 + $0x20] sm:$0xff]   ;;  %v571_v8 = vld [vmem:[#allocation7 + $0x10] sm:$0xff]   ;;  %s427_s29 = sshll.u32 %s711_s28, 4  ;;  %s428_s29 = int_to_ptr.vmem [resolvable:$true] %s427_s29 }
  0x4c   :  { %493 = vmatpush3.bf16.msra.mxu0 %v561_v1  ;;  %513 = vmatpush3.bf16.msra.mxu1 %v569_v4  ;;  %v566_v9 = vld [vmem:[#allocation5 + $0x28] sm:$0xff]   ;;  %v572_v10 = vld [vmem:[#allocation7 + $0x18] sm:$0xff]   ;;  %v567_v11 = vld [vmem:[#allocation5 + $0x30] sm:$0xff]   ;;  %p678_p5 = scmp.lt.s32.totalorder %s428_s29, %s428_s29 }
  0x4d   :  { %494 = vmatprep.subr.bf16.mxu0 %v709_v0  ;;  %514 = vmatprep.subr.bf16.mxu1 %v709_v0  ;;  %v573_v12 = vld [vmem:[#allocation7 + $0x20] sm:$0xff]   ;;  %v568_v13 = vld [vmem:[#allocation5 + $0x38] sm:$0xff]   ;;  %v574_v14 = vld [vmem:[#allocation7 + $0x28] sm:$0xff]  }
  0x4e   :  { %v81_v15 = vld [vmem:[#allocation2] sm:$0xf]  ;;  %v575_v16 = vld [vmem:[#allocation7 + $0x30] sm:$0xff]   ;;  %v577_v18 = vld [vmem:[#allocation8] sm:$0xff]  }
  0x4f   :  { %v576_v17 = vld [vmem:[#allocation7 + $0x38] sm:$0xff]   ;;  %v578_v19 = vld [vmem:[#allocation8 + $0x8] sm:$0xff]   ;;  %v579_v20 = vld [vmem:[#allocation8 + $0x10] sm:$0xff]  }
  0x50   :  { %495 = vmatpush3.bf16.msra.mxu0 %v562_v2  ;;  %515 = vmatpush3.bf16.msra.mxu1 %v570_v6  ;;  %v580_v21 = vld [vmem:[#allocation8 + $0x18] sm:$0xff]   ;;  %v581_v22 = vld [vmem:[#allocation8 + $0x20] sm:$0xff]   ;;  %v582_v23 = vld [vmem:[#allocation8 + $0x28] sm:$0xff]  }
  0x51   :  { %496 = vmatprep.subr.bf16.mxu0 %v709_v0  ;;  %516 = vmatprep.subr.bf16.mxu1 %v709_v0  ;;  %v438_v24 = vld [vmem:[%s862_s2] ss:$0 sm:$0xff]  ;;  %v583_v32 = vld [vmem:[#allocation8 + $0x30] sm:$0xff]  }
  0x52   :  { %v584_v33 = vld [vmem:[#allocation8 + $0x38] sm:$0xff]  }
  0x53   :  { %v447_v34 = vld [vmem:[%s864_s4] ss:$0 sm:$0xff]  ;;  %s673_s4 = scalar_lea.vmem %s428_s29, 64 }
  0x54   :  { %497 = vmatpush3.bf16.msra.mxu0 %v563_v3  ;;  %517 = vmatpush3.bf16.msra.mxu1 %v571_v8  ;;  %v456_v42 = vld [vmem:[%s866_s6] ss:$0 sm:$0xff]  ;;  %p674_p4 = scmp.ne.s32.totalorder %s428_s29, %s673_s4  ;;  %p679_p6 = scmp.lt.s32.totalorder %s673_s4, %s673_s4 }
  0x55   :  { %498 = vmatprep.subr.bf16.mxu0 %v709_v0  ;;  %518 = vmatprep.subr.bf16.mxu1 %v709_v0 }
  0x56   :  { %p680_p7 = por %p679_p6, %p678_p5 }
  0x58   :  { %499 = vmatpush3.bf16.msra.mxu0 %v564_v5  ;;  %519 = vmatpush3.bf16.msra.mxu1 %v572_v10  ;;  %p681_p8 = pnand %p680_p7, %p674_p4 }
  0x59   :  { %500 = vmatprep.subr.bf16.mxu0 %v709_v0  ;;  %520 = vmatprep.subr.bf16.mxu1 %v709_v0 }
  0x5c   :  { %501 = vmatpush3.bf16.msra.mxu0 %v565_v7  ;;  %521 = vmatpush3.bf16.msra.mxu1 %v573_v12 }
  0x5d   :  { %502 = vmatprep.subr.bf16.mxu0 %v709_v0  ;;  %522 = vmatprep.subr.bf16.mxu1 %v709_v0 }
  0x60   :  { %503 = vmatpush3.bf16.msra.mxu0 %v566_v9  ;;  %523 = vmatpush3.bf16.msra.mxu1 %v574_v14 }
  0x61   :  { %504 = vmatprep.subr.bf16.mxu0 %v709_v0  ;;  %524 = vmatprep.subr.bf16.mxu1 %v709_v0 }
  0x64   :  { %505 = vmatpush3.bf16.msra.mxu0 %v567_v11  ;;  %525 = vmatpush3.bf16.msra.mxu1 %v575_v16 }
  0x65   :  { %506 = vmatprep.subr.bf16.mxu0 %v709_v0  ;;  %526 = vmatprep.subr.bf16.mxu1 %v709_v0 }
  0x68   :  { %507 = vmatpush3.bf16.msra.mxu0 %v568_v13  ;;  %527 = vmatpush3.bf16.msra.mxu1 %v576_v17 }
  0x69   :  { %532 = vmatprep.subr.bf16.mxu0 %v709_v0 }
  0x6b   :  { %509 = vmatmul.mubr.bf16.vlgmr.msra.gmra.mrb[0].mxu0 %v81_v15 }
  0x6c   :  { %548 = vmatprep.mubr.msk.bf16.mxu0 %vm710_vm0, %v709_v0  ;;  %533 = vmatpush3.bf16.msra.mxu0 %v577_v18 }
  0x6d   :  { %534 = vmatprep.subr.bf16.mxu0 %v709_v0 }
  0x70   :  { %535 = vmatpush3.bf16.msra.mxu0 %v578_v19 }
  0x71   :  { %536 = vmatprep.subr.bf16.mxu0 %v709_v0 }
  0x74   :  { %537 = vmatpush3.bf16.msra.mxu0 %v579_v20 }
  0x75   :  { %538 = vmatprep.subr.bf16.mxu0 %v709_v0 }
  0x78   :  { %539 = vmatpush3.bf16.msra.mxu0 %v580_v21 }
  0x79   :  { %540 = vmatprep.subr.bf16.mxu0 %v709_v0 }
  0x7c   :  { %541 = vmatpush3.bf16.msra.mxu0 %v581_v22 }
  0x7d   :  { %542 = vmatprep.subr.bf16.mxu0 %v709_v0 }
  0x80   :  { %543 = vmatpush3.bf16.msra.mxu0 %v582_v23 }
  0x81   :  { %544 = vmatprep.subr.bf16.mxu0 %v709_v0 }
  0x84   :  { %545 = vmatpush3.bf16.msra.mxu0 %v583_v32 }
  0x85   :  { %546 = vmatprep.subr.bf16.mxu0 %v709_v0 }
  0x88   :  { %547 = vmatpush3.bf16.msra.mxu0 %v584_v33 }
 0x13e   :  { %v187_v25 = vpop.f32.mrb[0].mxu0 }
 0x13f   :  { %v188_v26 = vadd.f32 %v438_v24, %v187_v25  ;;  %v510_v27 = vpop.f32.mrb[1].mxu0 }
 0x140   :  { %v190_v28 = vpop.f32.mrb[2].mxu0 }
 0x141   :  { %v193_v29 = vmax.f32 %v188_v26, 0.0  ;;  %v511_v30 = vpop.f32.mrb[3].mxu0 }
 0x143   :  { %v194_v31 = vpack.c.bf16 %v193_v29, %v193_v29 }
 0x145   :  { %529 = vmatmul.mubr.bf16.vlgmr.msra.gmra.mrb[0].mxu1 %v194_v31 }
 0x218   :  { %v300_v35 = vpop.f32.mrb[0].mxu1 }
 0x219   :  { %v301_v36 = vadd.f32 %v447_v34, %v300_v35  ;;  %v530_v37 = vpop.f32.mrb[1].mxu1 }
 0x21a   :  { %v303_v38 = vpop.f32.mrb[2].mxu1 }
 0x21b   :  { %v306_v39 = vmax.f32 %v301_v36, 0.0  ;;  %v531_v40 = vpop.f32.mrb[3].mxu1 }
 0x21d   :  { %v307_v41 = vpack.c.bf16 %v306_v39, %v306_v39 }
 0x21f   :  { %549 = vmatmul.mubr.bf16.vlgmr.msra.gmra.mrb[4].mxu0 %v307_v41 }
 0x2f2   :  { %v413_v43 = vpop.f32.mrb[4].mxu0 }
 0x2f3   :  { %v414_v44 = vadd.f32 %v456_v42, %v413_v43  ;;  %v550_v45 = vpop.f32.mrb[5].mxu0 }
 0x2f4   :  { %v416_v46 = vpop.f32.mrb[6].mxu0 }
 0x2f5   :  { %v419_v47 = vpack.c.bf16 %v414_v44, %v414_v44  ;;  %v551_v48 = vpop.f32.mrb[7].mxu0 }
 0x2f7   :  { %420 = vst [vmem:[#allocation10] sm:$0xf] %v419_v47 }
 0x2f8   :  { %684 = shalt.err (!%p681_p8)
}
 0x2f9   :  { %s685_s6 = scalar_lea.hbm %s867_s7, 64 }
 0x2fa   :  { %p686_p9 = scmp.ne.s32.totalorder %s867_s7, %s685_s6  ;;  %p689_p10 = scmp.lt.u32.totalorder %s685_s6, %s867_s7 }
 0x2fc   :  { %p691_p11 = pnand %p689_p10, %p686_p9 }
 0x2fe   :  { %694 = shalt.err (!%p691_p11)
}
 0x2ff   :  { %430 = dma.vmem_to_hbm [thread:$0]  %s428_s29, 64, %s867_s7, [#allocation4]  }
 0x300   :  { %701 = dma.done.wait [#allocation4], 64  }
 0x301   :  { %702 = vsyncadd [#allocation4], 4294967232 }
 0x302   :  { %434 = vsyncpa [#allocation3], 1 }
 0x303   :  { %435 = vsyncpa [#allocation6], 1 }
 0x304   :  { %436 = vsyncpa [#allocation9], 1 }
 0x305   :  { %437 = vsyncpa [#allocation4], 1 }

</bundles_post_ra>
